<compile_context>
chip_gen: v6e
topology: v6e:2x2x1
jax: 0.10.0
libtpu: 0.0.40
codegen_flags: <defaults>
</compile_context>

<pallas_src>
import functools

import jax
import jax.numpy as jnp
from jax import lax
from jax.experimental import pallas as pl
from jax.experimental.pallas import tpu as pltpu


def _round_up(x: int, m: int) -> int:
    return ((x + m - 1) // m) * m


def _linear_kernel(x_ref, w_ref, b_ref, o_ref, acc_ref):
    # x_ref:   (tm, tk)  activation tile (compute dtype, e.g. bf16)
    # w_ref:   (tn, tk)  weight tile in PyTorch (out, in) layout -> contract on dim 1
    # b_ref:   (1,  tn)  bias tile (f32)
    # o_ref:   (tm, tn)  output tile
    # acc_ref: (tm, tn)  f32 accumulator (VMEM scratch, persists across the K grid axis)
    k = pl.program_id(2)

    prod = lax.dot_general(
        x_ref[...], w_ref[...],
        dimension_numbers=(((1,), (1,)), ((), ())),   # (tm,tk) x (tn,tk)^T -> (tm,tn)
        preferred_element_type=jnp.float32,
    )

    @pl.when(k == 0)
    def _first():
        acc_ref[...] = prod            # assign, not zero-init + add

    @pl.when(k > 0)
    def _accum():
        acc_ref[...] += prod

    @pl.when(k == pl.num_programs(2) - 1)
    def _finalize():
        o_ref[...] = (acc_ref[...] + b_ref[...]).astype(o_ref.dtype)


def _pick_tk(K: int, block_k: int):
    """Choose K tile + padded K. Never collapses to tiny 128-wide steps."""
    if K <= block_k:
        return K, K                                   # single K step, full dim
    if K % block_k == 0:
        return block_k, K
    # largest 128-multiple divisor of K in [384, block_k] -> no padding needed
    d = block_k - (block_k % 128)
    while d >= 384:
        if K % d == 0:
            return d, K
        d -= 128
    # otherwise zero-pad K up to a block_k multiple (correctness-safe for the contraction)
    return block_k, _round_up(K, block_k)


@functools.partial(
    jax.jit, static_argnames=("block_m", "block_n", "block_k", "compute_dtype")
)
def quant_linear_forward(
    x,
    weight,
    bias=None,
    *,
    block_m: int = 512,
    block_n: int = 256,
    block_k: int = 1024,
    compute_dtype=jnp.bfloat16,
):
    """Pallas implementation of QuantLinear.forward in its default (no-quant) state.

    x:      (..., in_features)
    weight: (out_features, in_features)   -- PyTorch nn.Linear convention (NOT transposed)
    bias:   (out_features,) or None
    returns (..., out_features), dtype of x.

    compute_dtype: MXU input dtype (default bf16, f32 accumulation). Pass None or
    jnp.float32 for exact-f32 semantics.
    """
    *lead, K = x.shape
    N, K_w = weight.shape
    assert K == K_w, "in_features mismatch"

    M = 1
    for d in lead:
        M *= d

    out_dtype = x.dtype
    if compute_dtype is None:
        compute_dtype = x.dtype

    # ---- pre-cast operands once in the wrapper (halves HBM->VMEM traffic) ----
    x2d = x.reshape(M, K).astype(compute_dtype)
    w2d = weight.astype(compute_dtype)
    if bias is None:
        b2d = jnp.zeros((1, N), dtype=jnp.float32)
    else:
        b2d = bias.reshape(1, N).astype(jnp.float32)   # tiny; keep f32 for accuracy

    # ---- tile sizing ---------------------------------------------------------
    tm = min(block_m, M)          # full-dim block for small M, else 512 (mult of 8)
    tn = min(block_n, N)          # full-dim block for small N, else 256 (mult of 128)
    tk, K_pad = _pick_tk(K, block_k)

    # Only K padding is correctness-critical (it feeds the contraction).
    if K_pad != K:
        x2d = jnp.pad(x2d, ((0, 0), (0, K_pad - K)))
        w2d = jnp.pad(w2d, ((0, 0), (0, K_pad - K)))

    grid = (pl.cdiv(M, tm), pl.cdiv(N, tn), K_pad // tk)
    m_grid, n_grid, _ = grid

    csize = jnp.dtype(compute_dtype).itemsize
    osize = jnp.dtype(out_dtype).itemsize

    cost = pl.CostEstimate(
        flops=2 * M * N * K_pad,
        transcendentals=0,
        bytes_accessed=(
            M * K_pad * csize * n_grid        # x re-read per N block
            + N * K_pad * csize * m_grid      # weight re-read per M block
            + N * 4 * m_grid                  # bias
            + M * N * osize                   # output
        ),
    )

    # Double-buffered inputs + output + resident f32 accumulator.
    vmem_needed = (
        2 * (tm * tk * csize + tn * tk * csize + tn * 4 + tm * tn * osize)
        + tm * tn * 4
    )
    cp_kwargs = dict(dimension_semantics=("parallel", "parallel", "arbitrary"))
    if vmem_needed > 12 * 1024 * 1024:        # v5e default scoped VMEM is 16 MiB
        cp_kwargs["vmem_limit_bytes"] = int(min(vmem_needed * 3 // 2,
                                                50 * 1024 * 1024))

    out2d = pl.pallas_call(
        _linear_kernel,
        out_shape=jax.ShapeDtypeStruct((M, N), out_dtype),
        grid_spec=pltpu.PrefetchScalarGridSpec(
            num_scalar_prefetch=0,
            grid=grid,
            in_specs=[
                pl.BlockSpec((tm, tk), lambda i, j, k: (i, k)),  # activations
                pl.BlockSpec((tn, tk), lambda i, j, k: (j, k)),  # weight (out,in) layout
                pl.BlockSpec((1, tn), lambda i, j, k: (0, j)),   # bias
            ],
            out_specs=pl.BlockSpec((tm, tn), lambda i, j, k: (i, j)),
            scratch_shapes=[pltpu.VMEM((tm, tn), jnp.float32)],
        ),
        compiler_params=pltpu.CompilerParams(**cp_kwargs),
        cost_estimate=cost,
    )(x2d, w2d, b2d)

    return out2d.reshape(*lead, N)


def _ref_bf16(x, w, b):
    """Reference matching the kernel's bf16-MXU compute path (f32 accumulation)."""
    y = lax.dot_general(
        x.reshape(-1, x.shape[-1]).astype(jnp.bfloat16),
        w.astype(jnp.bfloat16),
        dimension_numbers=(((1,), (1,)), ((), ())),
        preferred_element_type=jnp.float32,
    )
    y = y + b.astype(jnp.float32)
    return y.reshape(*x.shape[:-1], w.shape[0]).astype(x.dtype)


if __name__ == "__main__":
    key = jax.random.PRNGKey(0)
    kx, kw, kb = jax.random.split(key, 3)

    # ---- test 1: small shapes consistent with nn.Linear -----------------------
    batch, seq, in_features, out_features = 2, 8, 32, 64
    x = jax.random.normal(kx, (batch, seq, in_features), dtype=jnp.float32)
    weight = jax.random.normal(kw, (out_features, in_features), dtype=jnp.float32) * 0.05
    bias = jax.random.normal(kb, (out_features,), dtype=jnp.float32) * 0.1

    out = jax.block_until_ready(quant_linear_forward(x, weight, bias))
    assert out.shape == (batch, seq, out_features)
    assert jnp.allclose(out, _ref_bf16(x, weight, bias), atol=1e-4, rtol=1e-4), \
        "mismatch vs bf16 reference"
    assert jnp.allclose(out, x @ weight.T + bias, atol=2e-2, rtol=2e-2), \
        "mismatch vs f32 reference"

    # ---- test 2: non-multiple shapes -> partial M/N edge blocks + multi-step K ----
    M2, K2, N2 = 150, 384, 272
    k1, k2, k3 = jax.random.split(jax.random.PRNGKey(1), 3)
    x2 = jax.random.normal(k1, (M2, K2), dtype=jnp.float32)
    w2 = jax.random.normal(k2, (N2, K2), dtype=jnp.float32) * 0.05
    b2 = jax.random.normal(k3, (N2,), dtype=jnp.float32) * 0.1
    out2 = jax.block_until_ready(
        quant_linear_forward(x2, w2, b2, block_m=64, block_n=128, block_k=128)
    )
    assert out2.shape == (M2, N2)
    assert jnp.allclose(out2, _ref_bf16(x2, w2, b2), atol=1e-3, rtol=1e-3), \
        "mismatch on partial-block / multi-K path"

    print("KERNEL_OK")
</pallas_src>

<mosaic_0001>
module attributes {stable_mosaic.version = 11 : i64} {
  func.func @_linear_kernel(%arg0: i32, %arg1: i32, %arg2: i32, %arg3: memref<16x32xbf16, #tpu.memory_space<vmem>>, %arg4: memref<64x32xbf16, #tpu.memory_space<vmem>>, %arg5: memref<1x64xf32, #tpu.memory_space<vmem>>, %arg6: memref<16x64xf32, #tpu.memory_space<vmem>>, %arg7: memref<16x64xf32, #tpu.memory_space<vmem>>) attributes {dimension_semantics = [#tpu.dimension_semantics<parallel>, #tpu.dimension_semantics<parallel>, #tpu.dimension_semantics<arbitrary>], iteration_bounds = array<i64: 1, 1, 1>, scalar_prefetch = 0 : i64, scratch_operands = 1 : i64, tpu.core_type = #tpu.core_type<tc>, window_params = [{transform_indices = @transform_0, window_bounds = array<i64: 16, 32>}, {transform_indices = @transform_1, window_bounds = array<i64: 64, 32>}, {transform_indices = @transform_2, window_bounds = array<i64: 1, 64>}, {transform_indices = @transform_3, window_bounds = array<i64: 16, 64>}]} {
    %c0 = arith.constant 0 : index
    %c0_0 = arith.constant 0 : index
    %0 = vector.load %arg3[%c0, %c0_0] : memref<16x32xbf16, #tpu.memory_space<vmem>>, vector<16x32xbf16>
    %c0_1 = arith.constant 0 : index
    %c0_2 = arith.constant 0 : index
    %1 = vector.load %arg4[%c0_1, %c0_2] : memref<64x32xbf16, #tpu.memory_space<vmem>>, vector<64x32xbf16>
    %cst = arith.constant dense<0.000000e+00> : vector<16x64xf32>
    %2 = tpu.matmul %0, %1, %cst {dimension_numbers = #tpu.dot_dimension_numbers<[1], [1], [0], [0], [0, 0, 1, 0], [], []>} : vector<16x32xbf16>, vector<64x32xbf16>, vector<16x64xf32> -> vector<16x64xf32>
    %c0_i32 = arith.constant 0 : i32
    %3 = arith.cmpi eq, %arg2, %c0_i32 : i32
    %4 = arith.extui %3 : i1 to i32
    %c0_i32_3 = arith.constant 0 : i32
    %5 = arith.cmpi ne, %4, %c0_i32_3 : i32
    scf.if %5 {
      %c0_8 = arith.constant 0 : index
      %c0_9 = arith.constant 0 : index
      %12 = vector.load %arg7[%c0_8, %c0_9] : memref<16x64xf32, #tpu.memory_space<vmem>>, vector<16x64xf32>
      tpu.vector_store %arg7[%c0_8, %c0_9], %2 {strides = array<i32>} : memref<16x64xf32, #tpu.memory_space<vmem>>, vector<16x64xf32>,
    } else {
    }
    %c0_i32_4 = arith.constant 0 : i32
    %6 = arith.cmpi sgt, %arg2, %c0_i32_4 : i32
    %7 = arith.extui %6 : i1 to i32
    %c0_i32_5 = arith.constant 0 : i32
    %8 = arith.cmpi ne, %7, %c0_i32_5 : i32
    scf.if %8 {
      %c0_8 = arith.constant 0 : index
      %c0_9 = arith.constant 0 : index
      %12 = vector.load %arg7[%c0_8, %c0_9] : memref<16x64xf32, #tpu.memory_space<vmem>>, vector<16x64xf32>
      %13 = arith.addf %12, %2 : vector<16x64xf32>
      %c0_10 = arith.constant 0 : index
      %c0_11 = arith.constant 0 : index
      %14 = vector.load %arg7[%c0_10, %c0_11] : memref<16x64xf32, #tpu.memory_space<vmem>>, vector<16x64xf32>
      tpu.vector_store %arg7[%c0_10, %c0_11], %13 {strides = array<i32>} : memref<16x64xf32, #tpu.memory_space<vmem>>, vector<16x64xf32>,
    } else {
    }
    %c0_i32_6 = arith.constant 0 : i32
    %9 = arith.cmpi eq, %arg2, %c0_i32_6 : i32
    %10 = arith.extui %9 : i1 to i32
    %c0_i32_7 = arith.constant 0 : i32
    %11 = arith.cmpi ne, %10, %c0_i32_7 : i32
    scf.if %11 {
      %c0_8 = arith.constant 0 : index
      %c0_9 = arith.constant 0 : index
      %12 = vector.load %arg7[%c0_8, %c0_9] : memref<16x64xf32, #tpu.memory_space<vmem>>, vector<16x64xf32>
      %c0_10 = arith.constant 0 : index
      %c0_11 = arith.constant 0 : index
      %13 = vector.load %arg5[%c0_10, %c0_11] : memref<1x64xf32, #tpu.memory_space<vmem>>, vector<1x64xf32>
      %14 = vector.broadcast %13 : vector<1x64xf32> to vector<16x64xf32>
      %15 = arith.addf %12, %14 : vector<16x64xf32>
      %c0_12 = arith.constant 0 : index
      %c0_13 = arith.constant 0 : index
      %16 = vector.load %arg6[%c0_12, %c0_13] : memref<16x64xf32, #tpu.memory_space<vmem>>, vector<16x64xf32>
      tpu.vector_store %arg6[%c0_12, %c0_13], %15 {strides = array<i32>} : memref<16x64xf32, #tpu.memory_space<vmem>>, vector<16x64xf32>,
    } else {
    }
    return
  }
  func.func @transform_0(%arg0: i32, %arg1: i32, %arg2: i32) -> (i32, i32) {
    %c0_i32 = arith.constant 0 : i32
    return %arg0, %arg2 : i32, i32
  }
  func.func @transform_1(%arg0: i32, %arg1: i32, %arg2: i32) -> (i32, i32) {
    %c0_i32 = arith.constant 0 : i32
    return %arg1, %arg2 : i32, i32
  }
  func.func @transform_2(%arg0: i32, %arg1: i32, %arg2: i32) -> (i32, i32) {
    %c0_i32 = arith.constant 0 : i32
    %c0_i32_0 = arith.constant 0 : i32
    return %c0_i32, %arg1 : i32, i32
  }
  func.func @transform_3(%arg0: i32, %arg1: i32, %arg2: i32) -> (i32, i32) {
    %c0_i32 = arith.constant 0 : i32
    return %arg0, %arg1 : i32, i32
  }
}

</mosaic_0001>

<bundles_post_ra>
// kernel: quant_linear_forward.1
= control target key start
LH: loop header
LB: loop body
LE: loop exit
PB: predicated region body
PF: predicated region fallthrough
CT: control target
= control target key end

     0   :  { %v215_v1 = vmov 0.0   ;;  %vm51_vm0 = vcmask 261120   ;;  %vm216_vm1 = vmmov 0   ;;  %s270_s0 = inlined_call_operand.vmem [shape: bf16[16,32], index: 0, kind: input, shape index: {}]   ;;  %s271_s1 = inlined_call_operand.vmem [shape: bf16[64,32], index: 1, kind: input, shape index: {}]   ;;  %s272_s2 = inlined_call_operand.vmem [shape: f32[1,64], index: 2, kind: input, shape index: {}]   ;;  %s273_s3 = inlined_call_operand.hbm [shape: f32[16,64], index: 3, kind: output, shape index: {}]  }
   0x1   :  { %v188_v0 = vld [vmem:[%s271_s1 + $0x18] sm:$0xff]   ;;  %171 = vmatprep.subr.bf16.mxu0 %v215_v1  ;;  %v189_v3 = vld [vmem:[%s271_s1 + $0x10] sm:$0xff]   ;;  %179 = vmatprep.mubr.msk.bf16.mxu0 %vm216_vm1, %v215_v1 }
   0x2   :  { %v65_v2 = vsel %vm51_vm0, %v188_v0, 0 }
   0x3   :  { %172 = vmatpush3.bf16.xpose.msra.mxu0 %v65_v2 }
   0x4   :  { %173 = vmatprep.subr.bf16.mxu0 %v215_v1 }
   0x5   :  { %8 = vsyncpa [#allocation4], 0  ;;  %v62_v4 = vsel %vm51_vm0, %v189_v3, 0  ;;  %v190_v5 = vld [vmem:[%s271_s1 + $0x8] sm:$0xff]   ;;  %v191_v7 = vld [vmem:[%s271_s1] sm:$0xff]   ;;  %vm112_vm2 = vcmask 523264  }
   0x6   :  { %v59_v6 = vsel %vm51_vm0, %v190_v5, 0  ;;  %v56_v8 = vsel %vm51_vm0, %v191_v7, 0  ;;  %v192_v9 = vld [vmem:[%s270_s0] sm:$0xff]   ;;  %s217_s23 = smov [#allocation3]  }
   0x7   :  { %v165_v14 = vld [vmem:[%s272_s2] ss:$0 sm:$0xff]  ;;  %s148_s24 = sshll.u32 %s217_s23, 4  ;;  %s149_s24 = int_to_ptr.vmem [resolvable:$true] %s148_s24 }
   0x8   :  { %s193_s0 = scalar_lea.vmem %s149_s24, 256  ;;  %p198_p1 = scmp.lt.s32.totalorder %s149_s24, %s149_s24 }
   0x9   :  { %p194_p0 = scmp.ne.s32.totalorder %s149_s24, %s193_s0  ;;  %p199_p2 = scmp.lt.s32.totalorder %s193_s0, %s193_s0 }
   0xb   :  { %174 = vmatpush3.bf16.xpose.msra.mxu0 %v62_v4  ;;  %p200_p3 = por %p199_p2, %p198_p1 }
   0xc   :  { %175 = vmatprep.subr.bf16.mxu0 %v215_v1 }
   0xd   :  { %p201_p4 = pnand %p200_p3, %p194_p0 }
  0x13   :  { %176 = vmatpush3.bf16.xpose.msra.mxu0 %v59_v6 }
  0x14   :  { %177 = vmatprep.subr.bf16.mxu0 %v215_v1 }
  0x1b   :  { %178 = vmatpush3.bf16.xpose.msra.mxu0 %v56_v8 }
  0x22   :  { %180 = vmatmul.mubr.msk.bf16.vlgmr.msra.gmra.mxu0 %vm51_vm0, %v192_v9 }
  0xe2   :  { %v101_v10 = vpop.f32.mrf.mxu0 }
  0xe3   :  { %113 = vst.msk [vmem:[#allocation2] sm:$0xff] %vm112_vm2, %v101_v10 }
  0xe4   :  { %v181_v11 = vpop.f32.mrf.mxu0 }
  0xe6   :  { %v104_v12 = vpop.f32.mrf.mxu0 }
  0xe7   :  { %114 = vst.msk [vmem:[#allocation2 + $0x8] sm:$0xff] %vm112_vm2, %v104_v12 }
  0xe8   :  { %v182_v13 = vpop.f32.mrf.mxu0 }
  0xea   :  { %v129_v15 = vld [vmem:[#allocation2] sm:$0xff] }
  0xeb   :  { %v138_v16 = vadd.f32 %v165_v14, %v129_v15 }
  0xed   :  { %141 = vst.msk [vmem:[#allocation3] sm:$0xff] %vm112_vm2, %v138_v16 }
  0xee   :  { %v130_v17 = vld [vmem:[#allocation2 + $0x8] sm:$0xff] }
  0xef   :  { %v139_v18 = vadd.f32 %v165_v14, %v130_v17 }
  0xf1   :  { %142 = vst.msk [vmem:[#allocation3 + $0x8] sm:$0xff] %vm112_vm2, %v139_v18 }
  0xf2   :  { %204 = shalt.err (!%p201_p4)
}
  0xf3   :  { %s218_s25 = smov 128   ;;  %s219_s2 = smov 8  }
  0xf4   :  { %154 = dma.vmem_to_hbm [thread:$0]  %s149_s24, 256, %s273_s3, [#allocation4], %s218_s25, %s218_s25, %s219_s2  }
  0xf5   :  { %213 = dma.done.wait [#allocation4], 256  }
  0xf6   :  { %214 = vsyncadd [#allocation4], 4294967040 }
  0xf7   :  { %158 = vsyncpa [#allocation4], 1 }

</bundles_post_ra>
